<compile_context>
chip_gen: v5e
topology: v5e:2x2
jax: 0.10.0
libtpu: 0.0.40
codegen_flags: <defaults>
</compile_context>

<pallas_src>
import functools

import jax
import jax.numpy as jnp
from jax.experimental import pallas as pl
from jax.experimental.pallas import tpu as pltpu


def _round_up(n, m):
    return ((n + m - 1) // m) * m


def _mlp_kernel(*refs, apply_dropout):
    """One batch tile: x(tile) @ W1 -> relu -> drop -> @ W2 -> relu -> drop -> @ W3."""
    if apply_dropout:
        (x_ref, w1_ref, b1_ref, w2_ref, b2_ref, w3_ref, b3_ref,
         m1_ref, m2_ref, o_ref) = refs
    else:
        (x_ref, w1_ref, b1_ref, w2_ref, b2_ref, w3_ref, b3_ref, o_ref) = refs
        m1_ref = m2_ref = None

    # fc1 -> relu -> dropout   (bf16 matmul inputs, f32 accumulate / elementwise)
    h1 = jnp.dot(x_ref[...], w1_ref[...], preferred_element_type=jnp.float32)
    h1 = jnp.maximum(h1 + b1_ref[...], 0.0)
    if apply_dropout:
        h1 = h1 * m1_ref[...]

    # fc2 -> relu -> dropout
    h2 = jnp.dot(h1.astype(jnp.bfloat16), w2_ref[...],
                 preferred_element_type=jnp.float32)
    h2 = jnp.maximum(h2 + b2_ref[...], 0.0)
    if apply_dropout:
        h2 = h2 * m2_ref[...]

    # fc3 (logits)
    out = jnp.dot(h2.astype(jnp.bfloat16), w3_ref[...],
                  preferred_element_type=jnp.float32)
    o_ref[...] = (out + b3_ref[...]).astype(o_ref.dtype)


def _dropout_scale_masks(key, shape1, shape2, p):
    """Inverted-dropout scale masks: 0 with prob p, 1/(1-p) with prob 1-p."""
    k1, k2 = jax.random.split(key)
    scale = 1.0 / (1.0 - p)
    m1 = (jax.random.uniform(k1, shape1) >= p).astype(jnp.float32) * scale
    m2 = (jax.random.uniform(k2, shape2) >= p).astype(jnp.float32) * scale
    return m1, m2


def bayesian_mlp_forward(x, params, *, dropout_prob, training=True, key=None,
                         batch_tile=256):
    """Forward pass of BayesianMLP via a single fused Pallas kernel.

    Args:
      x: (..., input_dim) array; flattened to (-1, input_dim) like x.view.
      params: dict with w1 (D,H1), b1 (1,H1), w2 (H1,H2), b2 (1,H2),
              w3 (H2,O), b3 (1,O)  (weights are the transpose of nn.Linear.weight).
      dropout_prob: python float p.
      training: if True, apply MC-dropout; else identity (eval mode).
      key: jax PRNGKey used for the dropout masks (different key per MC sample).
      batch_tile: batch tile size for the pipelined grid.

    Returns:
      (batch, output_dim) float32 logits.
    """
    input_dim = params["w1"].shape[0]
    hidden1 = params["w1"].shape[1]
    hidden2 = params["w2"].shape[1]
    output_dim = params["w3"].shape[1]

    x2d = x.reshape(-1, input_dim).astype(jnp.float32)
    batch = x2d.shape[0]

    # Lane-dense padded sizes (multiples of 128 on the lane axis).
    din_p = _round_up(input_dim, 128)
    h1_p = _round_up(hidden1, 128)
    h2_p = _round_up(hidden2, 128)
    dout_p = _round_up(output_dim, 128)

    tb = min(batch_tile, _round_up(batch, 8))
    batch_p = _round_up(batch, tb)
    grid = (batch_p // tb,)

    def pad2(a, rows, cols):
        a = jnp.asarray(a, jnp.float32)
        return jnp.pad(a, ((0, rows - a.shape[0]), (0, cols - a.shape[1])))

    # Matmul operands in bf16 (halves DMA bytes, MXU-native); biases stay f32.
    x_p = pad2(x2d, batch_p, din_p).astype(jnp.bfloat16)
    w1 = pad2(params["w1"], din_p, h1_p).astype(jnp.bfloat16)
    w2 = pad2(params["w2"], h1_p, h2_p).astype(jnp.bfloat16)
    w3 = pad2(params["w3"], h2_p, dout_p).astype(jnp.bfloat16)
    b1 = pad2(params["b1"], 1, h1_p)
    b2 = pad2(params["b2"], 1, h2_p)
    b3 = pad2(params["b3"], 1, dout_p)

    apply_dropout = bool(training) and float(dropout_prob) > 0.0

    # Batch-tiled inputs/outputs; weights/biases resident across all grid steps.
    in_specs = [
        pl.BlockSpec((tb, din_p), lambda i: (i, 0)),
        pl.BlockSpec((din_p, h1_p), lambda i: (0, 0)),
        pl.BlockSpec((1, h1_p), lambda i: (0, 0)),
        pl.BlockSpec((h1_p, h2_p), lambda i: (0, 0)),
        pl.BlockSpec((1, h2_p), lambda i: (0, 0)),
        pl.BlockSpec((h2_p, dout_p), lambda i: (0, 0)),
        pl.BlockSpec((1, dout_p), lambda i: (0, 0)),
    ]
    args = [x_p, w1, b1, w2, b2, w3, b3]

    if apply_dropout:
        if key is None:
            key = jax.random.PRNGKey(0)
        m1, m2 = _dropout_scale_masks(key, (batch_p, h1_p), (batch_p, h2_p),
                                      float(dropout_prob))
        in_specs += [
            pl.BlockSpec((tb, h1_p), lambda i: (i, 0)),
            pl.BlockSpec((tb, h2_p), lambda i: (i, 0)),
        ]
        args += [m1, m2]

    kernel = functools.partial(_mlp_kernel, apply_dropout=apply_dropout)

    out_p = pl.pallas_call(
        kernel,
        out_shape=jax.ShapeDtypeStruct((batch_p, dout_p), jnp.float32),
        grid=grid,
        in_specs=in_specs,
        out_specs=pl.BlockSpec((tb, dout_p), lambda i: (i, 0)),
        compiler_params=pltpu.CompilerParams(
            dimension_semantics=("parallel",)),
    )(*args)

    return out_p[:batch, :output_dim]


def init_params(key, input_dim, hidden1, hidden2, output_dim):
    """Deterministic parameter init (nn.Linear-style uniform)."""
    ks = jax.random.split(key, 6)

    def linear(kw, kb, fan_in, fan_out):
        bound = 1.0 / jnp.sqrt(fan_in)
        w = jax.random.uniform(kw, (fan_in, fan_out), jnp.float32, -bound, bound)
        b = jax.random.uniform(kb, (1, fan_out), jnp.float32, -bound, bound)
        return w, b

    w1, b1 = linear(ks[0], ks[1], input_dim, hidden1)
    w2, b2 = linear(ks[2], ks[3], hidden1, hidden2)
    w3, b3 = linear(ks[4], ks[5], hidden2, output_dim)
    return {"w1": w1, "b1": b1, "w2": w2, "b2": b2, "w3": w3, "b3": b3}


def _reference_forward(x, params, m1=None, m2=None):
    """Pure-JAX reference with the same bf16-matmul / f32-accumulate numerics."""
    bf = jnp.bfloat16
    h = jnp.dot(x.astype(bf), params["w1"].astype(bf),
                preferred_element_type=jnp.float32) + params["b1"]
    h = jnp.maximum(h, 0.0)
    if m1 is not None:
        h = h * m1
    h = jnp.dot(h.astype(bf), params["w2"].astype(bf),
                preferred_element_type=jnp.float32) + params["b2"]
    h = jnp.maximum(h, 0.0)
    if m2 is not None:
        h = h * m2
    return jnp.dot(h.astype(bf), params["w3"].astype(bf),
                   preferred_element_type=jnp.float32) + params["b3"]


if __name__ == "__main__":
    input_dim, hidden1, hidden2, output_dim = 32, 64, 64, 16
    dropout_prob = 0.5
    batch = 8

    root = jax.random.PRNGKey(0)
    kx, kp, kd = jax.random.split(root, 3)
    x = jax.random.normal(kx, (batch, input_dim), dtype=jnp.float32)
    params = init_params(kp, input_dim, hidden1, hidden2, output_dim)

    # --- Eval-mode forward (dropout = identity): check against pure-JAX ref. ---
    y_eval = bayesian_mlp_forward(x, params, dropout_prob=dropout_prob,
                                  training=False)
    y_eval = jax.block_until_ready(y_eval)
    assert y_eval.shape == (batch, output_dim)
    y_ref_eval = _reference_forward(x, params)
    assert jnp.allclose(y_eval, y_ref_eval, atol=1e-4, rtol=1e-4), (
        "eval-mode mismatch")

    # --- Training-mode (MC-dropout) forward: check against ref with same masks. ---
    y_train = bayesian_mlp_forward(x, params, dropout_prob=dropout_prob,
                                   training=True, key=kd)
    y_train = jax.block_until_ready(y_train)
    assert y_train.shape == (batch, output_dim)

    batch_p = _round_up(batch, min(256, _round_up(batch, 8)))
    h1_p, h2_p = _round_up(hidden1, 128), _round_up(hidden2, 128)
    m1_full, m2_full = _dropout_scale_masks(kd, (batch_p, h1_p), (batch_p, h2_p),
                                            dropout_prob)
    y_ref_train = _reference_forward(x, params,
                                     m1=m1_full[:batch, :hidden1],
                                     m2=m2_full[:batch, :hidden2])
    assert jnp.allclose(y_train, y_ref_train, atol=1e-4, rtol=1e-4), (
        "train-mode mismatch")

    print("KERNEL_OK")
</pallas_src>

<mosaic_0001>
module attributes {stable_mosaic.version = 11 : i64} {
  func.func @_mlp_kernel(%arg0: i32, %arg1: memref<8x128xbf16, #tpu.memory_space<vmem>>, %arg2: memref<128x128xbf16, #tpu.memory_space<vmem>>, %arg3: memref<1x128xf32, #tpu.memory_space<vmem>>, %arg4: memref<128x128xbf16, #tpu.memory_space<vmem>>, %arg5: memref<1x128xf32, #tpu.memory_space<vmem>>, %arg6: memref<128x128xbf16, #tpu.memory_space<vmem>>, %arg7: memref<1x128xf32, #tpu.memory_space<vmem>>, %arg8: memref<8x128xf32, #tpu.memory_space<vmem>>) attributes {dimension_semantics = [#tpu.dimension_semantics<parallel>], iteration_bounds = array<i64: 1>, scalar_prefetch = 0 : i64, scratch_operands = 0 : i64, tpu.core_type = #tpu.core_type<tc>, window_params = [{transform_indices = @transform_0, window_bounds = array<i64: 8, 128>}, {pipeline_mode = #tpu.pipeline_mode<synchronous>, transform_indices = @transform_1, window_bounds = array<i64: 128, 128>}, {pipeline_mode = #tpu.pipeline_mode<synchronous>, transform_indices = @transform_2, window_bounds = array<i64: 1, 128>}, {pipeline_mode = #tpu.pipeline_mode<synchronous>, transform_indices = @transform_3, window_bounds = array<i64: 128, 128>}, {pipeline_mode = #tpu.pipeline_mode<synchronous>, transform_indices = @transform_4, window_bounds = array<i64: 1, 128>}, {pipeline_mode = #tpu.pipeline_mode<synchronous>, transform_indices = @transform_5, window_bounds = array<i64: 128, 128>}, {pipeline_mode = #tpu.pipeline_mode<synchronous>, transform_indices = @transform_6, window_bounds = array<i64: 1, 128>}, {transform_indices = @transform_7, window_bounds = array<i64: 8, 128>}]} {
    %c0 = arith.constant 0 : index
    %c0_0 = arith.constant 0 : index
    %0 = vector.load %arg1[%c0, %c0_0] : memref<8x128xbf16, #tpu.memory_space<vmem>>, vector<8x128xbf16>
    %c0_1 = arith.constant 0 : index
    %c0_2 = arith.constant 0 : index
    %1 = vector.load %arg2[%c0_1, %c0_2] : memref<128x128xbf16, #tpu.memory_space<vmem>>, vector<128x128xbf16>
    %cst = arith.constant dense<0.000000e+00> : vector<8x128xf32>
    %2 = tpu.matmul %0, %1, %cst {dimension_numbers = #tpu.dot_dimension_numbers<[1], [0], [0], [1], [0, 0, 1, 1], [], []>} : vector<8x128xbf16>, vector<128x128xbf16>, vector<8x128xf32> -> vector<8x128xf32>
    %c0_3 = arith.constant 0 : index
    %c0_4 = arith.constant 0 : index
    %3 = vector.load %arg3[%c0_3, %c0_4] : memref<1x128xf32, #tpu.memory_space<vmem>>, vector<1x128xf32>
    %4 = vector.broadcast %3 : vector<1x128xf32> to vector<8x128xf32>
    %5 = arith.addf %2, %4 : vector<8x128xf32>
    %cst_5 = arith.constant 0.000000e+00 : f32
    %6 = vector.broadcast %cst_5 : f32 to vector<8x128xf32>
    %7 = arith.maximumf %5, %6 : vector<8x128xf32>
    %8 = arith.truncf %7 : vector<8x128xf32> to vector<8x128xbf16>
    %c0_6 = arith.constant 0 : index
    %c0_7 = arith.constant 0 : index
    %9 = vector.load %arg4[%c0_6, %c0_7] : memref<128x128xbf16, #tpu.memory_space<vmem>>, vector<128x128xbf16>
    %cst_8 = arith.constant dense<0.000000e+00> : vector<8x128xf32>
    %10 = tpu.matmul %8, %9, %cst_8 {dimension_numbers = #tpu.dot_dimension_numbers<[1], [0], [0], [1], [0, 0, 1, 1], [], []>} : vector<8x128xbf16>, vector<128x128xbf16>, vector<8x128xf32> -> vector<8x128xf32>
    %c0_9 = arith.constant 0 : index
    %c0_10 = arith.constant 0 : index
    %11 = vector.load %arg5[%c0_9, %c0_10] : memref<1x128xf32, #tpu.memory_space<vmem>>, vector<1x128xf32>
    %12 = vector.broadcast %11 : vector<1x128xf32> to vector<8x128xf32>
    %13 = arith.addf %10, %12 : vector<8x128xf32>
    %cst_11 = arith.constant 0.000000e+00 : f32
    %14 = vector.broadcast %cst_11 : f32 to vector<8x128xf32>
    %15 = arith.maximumf %13, %14 : vector<8x128xf32>
    %16 = arith.truncf %15 : vector<8x128xf32> to vector<8x128xbf16>
    %c0_12 = arith.constant 0 : index
    %c0_13 = arith.constant 0 : index
    %17 = vector.load %arg6[%c0_12, %c0_13] : memref<128x128xbf16, #tpu.memory_space<vmem>>, vector<128x128xbf16>
    %cst_14 = arith.constant dense<0.000000e+00> : vector<8x128xf32>
    %18 = tpu.matmul %16, %17, %cst_14 {dimension_numbers = #tpu.dot_dimension_numbers<[1], [0], [0], [1], [0, 0, 1, 1], [], []>} : vector<8x128xbf16>, vector<128x128xbf16>, vector<8x128xf32> -> vector<8x128xf32>
    %c0_15 = arith.constant 0 : index
    %c0_16 = arith.constant 0 : index
    %19 = vector.load %arg7[%c0_15, %c0_16] : memref<1x128xf32, #tpu.memory_space<vmem>>, vector<1x128xf32>
    %20 = vector.broadcast %19 : vector<1x128xf32> to vector<8x128xf32>
    %21 = arith.addf %18, %20 : vector<8x128xf32>
    %c0_17 = arith.constant 0 : index
    %c0_18 = arith.constant 0 : index
    %22 = vector.load %arg8[%c0_17, %c0_18] : memref<8x128xf32, #tpu.memory_space<vmem>>, vector<8x128xf32>
    tpu.vector_store %arg8[%c0_17, %c0_18], %21 {strides = array<i32>} : memref<8x128xf32, #tpu.memory_space<vmem>>, vector<8x128xf32>,
    return
  }
  func.func @transform_0(%arg0: i32) -> (i32, i32) {
    %c0_i32 = arith.constant 0 : i32
    %c0_i32_0 = arith.constant 0 : i32
    return %arg0, %c0_i32 : i32, i32
  }
  func.func @transform_1(%arg0: i32) -> (i32, i32) {
    %c0_i32 = arith.constant 0 : i32
    %c0_i32_0 = arith.constant 0 : i32
    %c0_i32_1 = arith.constant 0 : i32
    return %c0_i32, %c0_i32_0 : i32, i32
  }
  func.func @transform_2(%arg0: i32) -> (i32, i32) {
    %c0_i32 = arith.constant 0 : i32
    %c0_i32_0 = arith.constant 0 : i32
    %c0_i32_1 = arith.constant 0 : i32
    return %c0_i32, %c0_i32_0 : i32, i32
  }
  func.func @transform_3(%arg0: i32) -> (i32, i32) {
    %c0_i32 = arith.constant 0 : i32
    %c0_i32_0 = arith.constant 0 : i32
    %c0_i32_1 = arith.constant 0 : i32
    return %c0_i32, %c0_i32_0 : i32, i32
  }
  func.func @transform_4(%arg0: i32) -> (i32, i32) {
    %c0_i32 = arith.constant 0 : i32
    %c0_i32_0 = arith.constant 0 : i32
    %c0_i32_1 = arith.constant 0 : i32
    return %c0_i32, %c0_i32_0 : i32, i32
  }
  func.func @transform_5(%arg0: i32) -> (i32, i32) {
    %c0_i32 = arith.constant 0 : i32
    %c0_i32_0 = arith.constant 0 : i32
    %c0_i32_1 = arith.constant 0 : i32
    return %c0_i32, %c0_i32_0 : i32, i32
  }
  func.func @transform_6(%arg0: i32) -> (i32, i32) {
    %c0_i32 = arith.constant 0 : i32
    %c0_i32_0 = arith.constant 0 : i32
    %c0_i32_1 = arith.constant 0 : i32
    return %c0_i32, %c0_i32_0 : i32, i32
  }
  func.func @transform_7(%arg0: i32) -> (i32, i32) {
    %c0_i32 = arith.constant 0 : i32
    %c0_i32_0 = arith.constant 0 : i32
    return %arg0, %c0_i32 : i32, i32
  }
}

</mosaic_0001>

<bundles_post_ra>
// kernel: tpu_custom_call.1
= control target key start
LH: loop header
LB: loop body
LE: loop exit
PB: predicated region body
PF: predicated region fallthrough
CT: control target
= control target key end

     0   :  { %12 = vsyncpa [#allocation3], 0  ;;  %s685_s0 = inlined_call_operand.hbm [shape: bf16[8,128], index: 0, kind: input, shape index: {}]   ;;  %s686_s1 = inlined_call_operand.hbm [shape: bf16[128,128], index: 1, kind: input, shape index: {}]   ;;  %s687_s2 = inlined_call_operand.vmem [shape: f32[1,128], index: 2, kind: input, shape index: {}]   ;;  %s688_s3 = inlined_call_operand.hbm [shape: bf16[128,128], index: 3, kind: input, shape index: {}]   ;;  %s689_s4 = inlined_call_operand.vmem [shape: f32[1,128], index: 4, kind: input, shape index: {}]   ;;  %s690_s5 = inlined_call_operand.hbm [shape: bf16[128,128], index: 5, kind: input, shape index: {}]   ;;  %s691_s6 = inlined_call_operand.vmem [shape: f32[1,128], index: 6, kind: input, shape index: {}]   ;;  %s692_s7 = inlined_call_operand.hbm [shape: f32[8,128], index: 7, kind: output, shape index: {}]  }
   0x1   :  { %13 = vsyncpa [#allocation6], 0 }
   0x2   :  { %14 = vsyncpa [#allocation9], 0  ;;  %s31_s26 = sshll.u32 %s686_s1, 4  ;;  %s32_s26 = int_to_ptr.hbm [resolvable:$true] %s31_s26 }
   0x3   :  { %15 = vsyncpa [#allocation4], 0  ;;  %s614_s27 = smov [#allocation5]   ;;  %s21_s8 = sshll.u32 %s685_s0, 4  ;;  %s22_s8 = int_to_ptr.hbm [resolvable:$true] %s21_s8 }
   0x4   :  { %s33_s28 = sshll.u32 %s614_s27, 4  ;;  %s615_s9 = smov 64   ;;  %s34_s28 = int_to_ptr.vmem [resolvable:$true] %s33_s28 }
   0x5   :  { %s616_s10 = smov 4   ;;  %s617_s11 = smov [#allocation2]  }
   0x6   :  { %39 = dma.hbm_to_vmem [thread:$0]  %s32_s26, 1024, %s34_s28, [#allocation6], %s615_s9, %s615_s9, %s616_s10  }
   0x7   :  { %s23_s12 = sshll.u32 %s617_s11, 4  ;;  %s46_s15 = sshll.u32 %s688_s3, 4  ;;  %s24_s12 = int_to_ptr.vmem [resolvable:$true] %s23_s12  ;;  %s47_s15 = int_to_ptr.hbm [resolvable:$true] %s46_s15 }
   0x8   :  { %26 = dma.hbm_to_vmem [thread:$0]  %s22_s8, 64, %s24_s12, [#allocation3]  }
   0x9   :  { %s61_s17 = sshll.u32 %s690_s5, 4  ;;  %s618_s18 = smov [#allocation7]   ;;  %s62_s17 = int_to_ptr.hbm [resolvable:$true] %s61_s17 }
   0xa   :  { %s48_s19 = sshll.u32 %s618_s18, 4  ;;  %s619_s0 = smov [#allocation8]   ;;  %s49_s19 = int_to_ptr.vmem [resolvable:$true] %s48_s19 }
   0xb   :  { %54 = dma.hbm_to_vmem [thread:$0]  %s47_s15, 1024, %s49_s19, [#allocation6], %s615_s9, %s615_s9, %s616_s10  }
   0xc   :  { %s63_s20 = sshll.u32 %s619_s0, 4  ;;  %s64_s20 = int_to_ptr.vmem [resolvable:$true] %s63_s20 }
   0xd   :  { %69 = dma.hbm_to_vmem [thread:$0]  %s62_s17, 1024, %s64_s20, [#allocation9], %s615_s9, %s615_s9, %s616_s10  }
   0xe   :  { %606 = dma.done.wait [#allocation3], 64  }
   0xf   :  { %607 = vsyncadd [#allocation3], 4294967232 }
  0x10   :  { %608 = dma.done.wait [#allocation6], 2048  }
  0x11   :  { %609 = vsyncadd [#allocation6], 4294965248 }
  0x12   :  { %610 = dma.done.wait [#allocation9], 1024  }
  0x13   :  { %611 = vsyncadd [#allocation9], 4294966272  ;;  %v459_v0 = vld [vmem:[#allocation5 + $0x38] sm:$0xff]  ;;  %v458_v1 = vld [vmem:[#allocation5 + $0x30] sm:$0xff]  ;;  %s620_s24 = smov [#allocation10]   ;;  %s344_s28 = sshll.u32 %s692_s7, 4  ;;  %s345_s28 = int_to_ptr.hbm [resolvable:$true] %s344_s28 }
  0x14   :  { %157 = vmatpush.bf16.msra.mxu0 %v459_v0  ;;  %v467_v2 = vld [vmem:[#allocation7 + $0x38] sm:$0xff]  ;;  %v466_v3 = vld [vmem:[#allocation7 + $0x30] sm:$0xff]  ;;  %v457_v4 = vld [vmem:[#allocation5 + $0x28] sm:$0xff]  ;;  %s342_s25 = sshll.u32 %s620_s24, 4  ;;  %s343_s25 = int_to_ptr.vmem [resolvable:$true] %s342_s25 }
  0x15   :  { %240 = vmatpush.bf16.msra.mxu1 %v467_v2  ;;  %v465_v5 = vld [vmem:[#allocation7 + $0x28] sm:$0xff]  ;;  %v456_v6 = vld [vmem:[#allocation5 + $0x20] sm:$0xff]  ;;  %v455_v8 = vld [vmem:[#allocation5 + $0x18] sm:$0xff] }
  0x16   :  { %v464_v7 = vld [vmem:[#allocation7 + $0x20] sm:$0xff]  ;;  %v463_v9 = vld [vmem:[#allocation7 + $0x18] sm:$0xff]  ;;  %v454_v10 = vld [vmem:[#allocation5 + $0x10] sm:$0xff] }
  0x17   :  { %v462_v11 = vld [vmem:[#allocation7 + $0x10] sm:$0xff]  ;;  %v453_v12 = vld [vmem:[#allocation5 + $0x8] sm:$0xff]  ;;  %v452_v13 = vld [vmem:[#allocation5] sm:$0xff] }
  0x18   :  { %158 = vmatpush.bf16.msra.mxu0 %v458_v1  ;;  %v88_v14 = vld [vmem:[#allocation2] sm:$0xf]  ;;  %v461_v15 = vld [vmem:[#allocation7 + $0x8] sm:$0xff]  ;;  %v460_v16 = vld [vmem:[#allocation7] sm:$0xff] }
  0x19   :  { %241 = vmatpush.bf16.msra.mxu1 %v466_v3  ;;  %v475_v17 = vld [vmem:[#allocation8 + $0x38] sm:$0xff]  ;;  %v474_v18 = vld [vmem:[#allocation8 + $0x30] sm:$0xff]  ;;  %v473_v19 = vld [vmem:[#allocation8 + $0x28] sm:$0xff] }
  0x1a   :  { %323 = vmatpush.bf16.msra.mxu2 %v475_v17  ;;  %v472_v20 = vld [vmem:[#allocation8 + $0x20] sm:$0xff]  ;;  %v471_v21 = vld [vmem:[#allocation8 + $0x18] sm:$0xff]  ;;  %v470_v22 = vld [vmem:[#allocation8 + $0x10] sm:$0xff] }
  0x1b   :  { %v483_v23 = vld [vmem:[%s687_s2] ss:$0 sm:$0xff]  ;;  %v469_v29 = vld [vmem:[#allocation8 + $0x8] sm:$0xff]  ;;  %v468_v30 = vld [vmem:[#allocation8] sm:$0xff] }
  0x1c   :  { %159 = vmatpush.bf16.msra.mxu0 %v457_v4  ;;  %v484_v31 = vld [vmem:[%s689_s4] ss:$0 sm:$0xff] }
  0x1d   :  { %242 = vmatpush.bf16.msra.mxu1 %v465_v5  ;;  %v485_v37 = vld [vmem:[%s691_s6] ss:$0 sm:$0xff] }
  0x1e   :  { %324 = vmatpush.bf16.msra.mxu2 %v474_v18 }
  0x20   :  { %160 = vmatpush.bf16.msra.mxu0 %v456_v6 }
  0x21   :  { %243 = vmatpush.bf16.msra.mxu1 %v464_v7 }
  0x22   :  { %325 = vmatpush.bf16.msra.mxu2 %v473_v19 }
  0x24   :  { %161 = vmatpush.bf16.msra.mxu0 %v455_v8 }
  0x25   :  { %244 = vmatpush.bf16.msra.mxu1 %v463_v9 }
  0x26   :  { %326 = vmatpush.bf16.msra.mxu2 %v472_v20 }
  0x28   :  { %162 = vmatpush.bf16.msra.mxu0 %v454_v10 }
  0x29   :  { %245 = vmatpush.bf16.msra.mxu1 %v462_v11 }
  0x2a   :  { %327 = vmatpush.bf16.msra.mxu2 %v471_v21 }
  0x2c   :  { %163 = vmatpush.bf16.msra.mxu0 %v453_v12 }
  0x2d   :  { %246 = vmatpush.bf16.msra.mxu1 %v461_v15 }
  0x2e   :  { %328 = vmatpush.bf16.msra.mxu2 %v470_v22 }
  0x30   :  { %164 = vmatpush.bf16.msra.mxu0 %v452_v13 }
  0x31   :  { %247 = vmatpush.bf16.msra.mxu1 %v460_v16 }
  0x32   :  { %329 = vmatpush.bf16.msra.mxu2 %v469_v29 }
  0x33   :  { %165 = vmatmul.bf16.vlgmr.msra.gmra.mxu0 %v88_v14 }
  0x36   :  { %330 = vmatpush.bf16.msra.mxu2 %v468_v30 }
  0xb0   :  { %v166_v24 = vpop.f32.mrf.mxu0 }
  0xb1   :  { %v167_v25 = vadd.f32 %v483_v23, %v166_v24 }
  0xb3   :  { %v170_v26 = vmax.f32 %v167_v25, 0.0 }
  0xb5   :  { %v171_v27 = vpack.c.bf16 %v170_v26, %v170_v26 }
  0xb7   :  { %248 = vmatmul.bf16.vlgmr.msra.gmra.mxu1 %v171_v27 }
  0xb8   :  { %v168_v28 = vpop.f32.mrf.mxu0 }
 0x134   :  { %v249_v32 = vpop.f32.mrf.mxu1 }
 0x135   :  { %v250_v33 = vadd.f32 %v484_v31, %v249_v32 }
 0x137   :  { %v253_v34 = vmax.f32 %v250_v33, 0.0 }
 0x139   :  { %v254_v35 = vpack.c.bf16 %v253_v34, %v253_v34 }
 0x13b   :  { %331 = vmatmul.bf16.vlgmr.msra.gmra.mxu2 %v254_v35 }
 0x13c   :  { %v251_v36 = vpop.f32.mrf.mxu1 }
 0x1be   :  { %v332_v38 = vpop.f32.mrf.mxu2 }
 0x1bf   :  { %v333_v39 = vadd.f32 %v485_v37, %v332_v38 }
 0x1c1   :  { %336 = vst [vmem:[#allocation10] sm:$0xff] %v333_v39 }
 0x1c2   :  { %347 = dma.vmem_to_hbm [thread:$0]  %s343_s25, 128, %s345_s28, [#allocation4]  }
 0x1c6   :  { %v334_v40 = vpop.f32.mrf.mxu2 }
 0x1c7   :  { %612 = dma.done.wait [#allocation4], 128  }
 0x1c8   :  { %613 = vsyncadd [#allocation4], 4294967168 }
 0x1c9   :  { %352 = vsyncpa [#allocation3], 1 }
 0x1ca   :  { %353 = vsyncpa [#allocation6], 1 }
 0x1cb   :  { %354 = vsyncpa [#allocation9], 1 }
 0x1cc   :  { %355 = vsyncpa [#allocation4], 1 }

</bundles_post_ra>
